<compile_context>
chip_gen: v6e
topology: v6e:2x2x1
jax: 0.10.0
libtpu: 0.0.40
codegen_flags: <defaults>
</compile_context>

<pallas_src>
import jax
import jax.numpy as jnp
from jax.experimental import pallas as pl
from jax.experimental.pallas import tpu as pltpu


def _pos_embed_kernel(emb_ref, out_ref):
    # emb_ref : (1, L*H)  resident flattened rows 0..L-1 of the embedding table
    # out_ref : (TB, L*H) lane-dense output tile (TB batch rows)
    out_ref[...] = jnp.broadcast_to(emb_ref[...], out_ref.shape)


def _pick_batch_tile(batch, row_bytes, target_bytes=4 * 1024 * 1024):
    """Largest batch chunk giving ~target_bytes per output buffer, multiple of 8
    (or the full batch) so the second-to-last block dim is always legal."""
    tb = max(1, target_bytes // max(1, row_bytes))
    if tb >= batch:
        return batch
    tb = max(8, (tb // 8) * 8)
    return min(tb, batch)


def position_embedding_learned(locations, embedding_weight):
    """locations: (B, L) int array (values unused, only shape matters).
       embedding_weight: (num_locations, hidden_dim) float array.
       returns: (B, L, hidden_dim), same dtype as embedding_weight."""
    B, L = locations.shape[0], locations.shape[1]
    num_locations, H = embedding_weight.shape
    assert L <= num_locations

    dtype = embedding_weight.dtype
    itemsize = jnp.dtype(dtype).itemsize
    LH = L * H
    row_bytes = LH * itemsize

    # Slice to the arange(L) rows and flatten -> lane-dense (1, L*H) table view.
    # Block shape equals the full array dims, so any L lowers cleanly.
    emb_flat = embedding_weight[:L].reshape(1, LH)

    TB = _pick_batch_tile(B, row_bytes)
    grid = (pl.cdiv(B, TB),)

    out_flat = pl.pallas_call(
        _pos_embed_kernel,
        out_shape=jax.ShapeDtypeStruct((B, LH), dtype),
        grid_spec=pltpu.PrefetchScalarGridSpec(
            num_scalar_prefetch=0,
            grid=grid,
            in_specs=[
                # Constant index_map: the (1, L*H) table tile is fetched once
                # and stays resident across all batch chunks.
                pl.BlockSpec((1, LH), lambda b: (0, 0)),
            ],
            # Lane-dense output: last dim = L*H (multiple of 128 here),
            # TB rows per grid step.
            out_specs=pl.BlockSpec((TB, LH), lambda b: (b, 0)),
        ),
        compiler_params=pltpu.CompilerParams(
            dimension_semantics=("parallel",),
        ),
        cost_estimate=pl.CostEstimate(
            flops=0,
            transcendentals=0,
            bytes_accessed=(B * LH + LH) * itemsize,
        ),
    )(emb_flat)

    return out_flat.reshape(B, L, H)


if __name__ == "__main__":
    key = jax.random.PRNGKey(0)
    k_emb, k_loc = jax.random.split(key)

    hidden_dim = 32
    num_locations = 100
    B, L = 2, 8

    # nn.init.uniform_ -> U[0, 1)
    embedding_weight = jax.random.uniform(
        k_emb, (num_locations, hidden_dim), dtype=jnp.float32
    )
    # Location indices; values don't affect the output (only the shape does).
    locations = jax.random.randint(k_loc, (B, L), 0, num_locations, dtype=jnp.int32)

    out = position_embedding_learned(locations, embedding_weight)
    out = jax.block_until_ready(out)

    # Reference check in plain JAX.
    ref = jnp.broadcast_to(embedding_weight[:L][None, :, :], (B, L, hidden_dim))
    assert out.shape == (B, L, hidden_dim)
    assert jnp.allclose(out, ref)

    print("KERNEL_OK")
</pallas_src>

<mosaic_0001>
module attributes {stable_mosaic.version = 11 : i64} {
  func.func @_pos_embed_kernel(%arg0: i32, %arg1: memref<1x256xf32, #tpu.memory_space<vmem>>, %arg2: memref<2x256xf32, #tpu.memory_space<vmem>>) attributes {dimension_semantics = [#tpu.dimension_semantics<parallel>], iteration_bounds = array<i64: 1>, scalar_prefetch = 0 : i64, scratch_operands = 0 : i64, tpu.core_type = #tpu.core_type<tc>, window_params = [{pipeline_mode = #tpu.pipeline_mode<synchronous>, transform_indices = @transform_0, window_bounds = array<i64: 1, 256>}, {transform_indices = @transform_1, window_bounds = array<i64: 2, 256>}]} {
    %c0 = arith.constant 0 : index
    %c0_0 = arith.constant 0 : index
    %0 = vector.load %arg1[%c0, %c0_0] : memref<1x256xf32, #tpu.memory_space<vmem>>, vector<1x256xf32>
    %1 = vector.shape_cast %0 : vector<1x256xf32> to vector<1x256xf32>
    %2 = vector.broadcast %1 : vector<1x256xf32> to vector<2x256xf32>
    %c0_1 = arith.constant 0 : index
    %c0_2 = arith.constant 0 : index
    %3 = vector.load %arg2[%c0_1, %c0_2] : memref<2x256xf32, #tpu.memory_space<vmem>>, vector<2x256xf32>
    tpu.vector_store %arg2[%c0_1, %c0_2], %2 {strides = array<i32>} : memref<2x256xf32, #tpu.memory_space<vmem>>, vector<2x256xf32>,
    return
  }
  func.func @transform_0(%arg0: i32) -> (i32, i32) {
    %c0_i32 = arith.constant 0 : i32
    %c0_i32_0 = arith.constant 0 : i32
    %c0_i32_1 = arith.constant 0 : i32
    return %c0_i32, %c0_i32_0 : i32, i32
  }
  func.func @transform_1(%arg0: i32) -> (i32, i32) {
    %c0_i32 = arith.constant 0 : i32
    %c0_i32_0 = arith.constant 0 : i32
    return %arg0, %c0_i32 : i32, i32
  }
}

</mosaic_0001>

<bundles_post_ra>
// kernel: tpu_custom_call.1
= control target key start
LH: loop header
LB: loop body
LE: loop exit
PB: predicated region body
PF: predicated region fallthrough
CT: control target
= control target key end

     0   :  { %6 = vsyncpa [#allocation3], 0  ;;  %s121_s0 = inlined_call_operand.hbm [shape: f32[1,256], index: 0, kind: input, shape index: {}]   ;;  %s122_s1 = inlined_call_operand.hbm [shape: f32[2,256], index: 1, kind: output, shape index: {}]  }
   0x1   :  { %7 = vsyncpa [#allocation4], 0  ;;  %s103_s6 = smov [#allocation2]  }
   0x2   :  { %s14_s7 = sshll.u32 %s103_s6, 4  ;;  %s15_s7 = int_to_ptr.vmem [resolvable:$true] %s14_s7 }
   0x3   :  { %s67_s8 = scalar_lea.vmem %s15_s7, 32  ;;  %p72_p1 = scmp.lt.s32.totalorder %s15_s7, %s15_s7 }
   0x4   :  { %p68_p0 = scmp.ne.s32.totalorder %s15_s7, %s67_s8  ;;  %p73_p2 = scmp.lt.s32.totalorder %s67_s8, %s67_s8 }
   0x6   :  { %p74_p3 = por %p73_p2, %p72_p1 }
   0x8   :  { %p75_p4 = pnand %p74_p3, %p68_p0 }
   0xa   :  { %78 = shalt.err (!%p75_p4)
}
   0xb   :  { %17 = dma.hbm_to_vmem [thread:$0]  %s121_s0, 32, %s15_s7, [#allocation3]  }
   0xc   :  { %99 = dma.done.wait [#allocation3], 32  }
   0xd   :  { %100 = vsyncadd [#allocation3], 4294967264  ;;  %v23_v0 = vlaneseq  ;;  %v21_v4 = vld [vmem:[#allocation2] sm:$0x3]  ;;  %s104_s11 = smov [#allocation5]  }
   0xe   :  { %s47_s12 = sshll.u32 %s104_s11, 4  ;;  %s48_s12 = int_to_ptr.vmem [resolvable:$true] %s47_s12 }
   0xf   :  { %v24_v1 = vshrl.u32 %v23_v0, 7  ;;  %s79_s13 = scalar_lea.vmem %s48_s12, 64  ;;  %p84_p6 = scmp.lt.s32.totalorder %s48_s12, %s48_s12 }
  0x10   :  { %p80_p5 = scmp.ne.s32.totalorder %s48_s12, %s79_s13  ;;  %p85_p7 = scmp.lt.s32.totalorder %s79_s13, %s79_s13 }
  0x11   :  { %v25_v2 = vsub.s32 0, %v24_v1  ;;  %v29_v3 = vsub.s32 1, %v24_v1 }
  0x12   :  { %p86_p8 = por %p85_p7, %p84_p6 }
  0x13   :  { %v26_v5 = vrot.slane %v21_v4, %v25_v2  ;;  %v30_v6 = vrot.slane %v21_v4, %v29_v3 }
  0x14   :  { %p87_p9 = pnand %p86_p8, %p80_p5 }
  0x15   :  { %v31_v7 = vcombine.low %v26_v5, %v30_v6 }
  0x17   :  { %56 = vst.sshfl [vmem:[#allocation5] sm:$0x33 pattern:$0x76325410] %v31_v7 }
  0x18   :  { %90 = shalt.err (!%p87_p9)
}
  0x19   :  { %50 = dma.vmem_to_hbm [thread:$0]  %s48_s12, 64, %s122_s1, [#allocation4]  }
  0x1a   :  { %101 = dma.done.wait [#allocation4], 64  }
  0x1b   :  { %102 = vsyncadd [#allocation4], 4294967232 }
  0x1c   :  { %54 = vsyncpa [#allocation3], 1 }
  0x1d   :  { %55 = vsyncpa [#allocation4], 1 }

</bundles_post_ra>
